<compile_context>
chip_gen: v6e
topology: v6e:2x2x1
jax: 0.10.0
libtpu: 0.0.40
codegen_flags: <defaults>
</compile_context>

<pallas_src>
import jax
import jax.numpy as jnp
import numpy as np
from jax.experimental import pallas as pl
from jax.experimental.pallas import tpu as pltpu


def _round_up(v, m):
    return (v + m - 1) // m * m


def _factorized_linear_kernel(x_ref, win_ref, wout_ref, b_ref, o_ref, h_ref):
    # Grid = (batch tiles i, out_feature tiles j); j is innermost/sequential.
    # Compute the low-rank intermediate once per batch tile, reuse across j.
    @pl.when(pl.program_id(1) == 0)
    def _():
        h = jnp.dot(x_ref[...], win_ref[...],
                    preferred_element_type=jnp.float32)
        h_ref[...] = h.astype(h_ref.dtype)

    y = jnp.dot(h_ref[...], wout_ref[...],
                preferred_element_type=jnp.float32)
    o_ref[...] = (y + b_ref[...].astype(jnp.float32)).astype(o_ref.dtype)


def prepare_factorized_linear_params(input_weight, output_weight, bias,
                                     dtype=None):
    """One-time weight prep (hoisted out of the per-call hot path).

    input_weight:  (rank, in_features)    (PyTorch layout)
    output_weight: (out_features, rank)   (PyTorch layout)
    bias:          (out_features,)
    dtype: optional compute dtype for weights/bias (e.g. jnp.bfloat16 on v5e,
           where f32 MXU/HBM throughput is poor). None keeps the native dtype.
    """
    out_features, rank = output_weight.shape
    in_features = input_weight.shape[1]
    if dtype is not None:
        input_weight = input_weight.astype(dtype)
        output_weight = output_weight.astype(dtype)
        bias = bias.astype(dtype)

    rank_pad = _round_up(rank, 128)       # lane-dense MXU tiles
    n_pad = _round_up(out_features, 128)  # lane-dense output stores

    w_in_p = (jnp.zeros((in_features, rank_pad), input_weight.dtype)
              .at[:, :rank].set(input_weight.T))           # (in, rank_pad)
    w_out_p = (jnp.zeros((rank_pad, n_pad), output_weight.dtype)
               .at[:rank, :out_features].set(output_weight.T))  # (rank_pad, n_pad)
    bias_p = jnp.zeros((1, n_pad), bias.dtype).at[0, :out_features].set(bias)

    return {"w_in": w_in_p, "w_out": w_out_p, "bias": bias_p,
            "in_features": in_features, "out_features": out_features,
            "rank": rank}


def factorized_linear(x, params, *, tm=256, tn=512):
    """FactorizedLinear forward (inference path, no masks).

    x:      (..., in_features)
    params: output of prepare_factorized_linear_params()
    returns (..., out_features)
    """
    # TODO(synk): the `masks` rank-pruning path of forward() is not implemented.
    w_in_p, w_out_p, bias_p = params["w_in"], params["w_out"], params["bias"]
    in_features = params["in_features"]
    out_features = params["out_features"]
    rank = params["rank"]
    rank_pad = w_in_p.shape[1]
    n_pad = w_out_p.shape[1]

    orig_shape = x.shape
    assert orig_shape[-1] == in_features
    x2d = x.reshape(-1, in_features)
    B = x2d.shape[0]
    # Only pad the batch up to a multiple of 8 when necessary (tiny copy);
    # ragged grid tiles handle the rest via masked output writeback.
    B8 = _round_up(B, 8)
    if B8 != B:
        x2d = jnp.pad(x2d, ((0, B8 - B), (0, 0)))

    out_dtype = x2d.dtype
    # Keep h in the weight dtype: bf16 weights -> bf16 h -> full-rate MXU on the
    # second matmul; f32 weights -> f32 h (matches an f32 reference exactly).
    h_dtype = w_out_p.dtype

    tm_eff = min(_round_up(tm, 8), B8)
    tn_eff = min(_round_up(max(tn, 128), 128), n_pad)

    # ---- generation-aware VMEM budget --------------------------------------
    try:
        vmem_cap = int(pltpu.get_tpu_info().vmem_capacity_bytes)
    except Exception:
        vmem_cap = 64 << 20  # conservative fallback (works on all generations)
    cap = int(vmem_cap * 0.8)  # ~51 MiB on v7x, ~102 MiB on v5e/v6e

    def vmem_needed(tm_e, tn_e):
        return int(
            2 * tm_e * in_features * x2d.dtype.itemsize          # x tile (dbl-buf)
            + 1 * in_features * rank_pad * w_in_p.dtype.itemsize  # resident W_in
            + 2 * rank_pad * tn_e * w_out_p.dtype.itemsize        # W_out tile
            + 2 * 8 * tn_e * bias_p.dtype.itemsize                # bias tile
            + 2 * tm_e * tn_e * jnp.dtype(out_dtype).itemsize     # out tile
            + tm_e * rank_pad * jnp.dtype(h_dtype).itemsize)      # h scratch

    # Shrink tiles only if the budget demands it (keeps tiles as big as possible
    # to amortize per-grid-step overhead and minimize W_out re-streaming).
    while vmem_needed(tm_eff, tn_eff) > cap and (tm_eff > 8 or tn_eff > 128):
        if tn_eff > 128 and tn_eff >= tm_eff:
            tn_eff = max(128, _round_up(tn_eff // 2, 128))
        elif tm_eff > 8:
            tm_eff = max(8, _round_up(tm_eff // 2, 8))
        else:
            break
    # TODO(synk): if W_in alone exceeds the VMEM cap (huge in_features*rank on
    # v7x's 64 MiB), add a K grid axis streaming W_in in (tk, rank_pad) chunks
    # with h accumulated in scratch; for very large B, a two-pass structure
    # (H = x@W_in^T to HBM, then tiled H@W_out^T) removes repeated W_out reads.

    grid = (pl.cdiv(B8, tm_eff), pl.cdiv(n_pad, tn_eff))

    flops = 2 * B * in_features * rank + 2 * B * rank * out_features
    bytes_accessed = int(
        x2d.size * x2d.dtype.itemsize
        + w_in_p.size * w_in_p.dtype.itemsize
        + grid[0] * w_out_p.size * w_out_p.dtype.itemsize   # W_out per batch tile
        + grid[0] * bias_p.size * bias_p.dtype.itemsize
        + B8 * n_pad * jnp.dtype(out_dtype).itemsize)

    vmem_limit = int(min(max(vmem_needed(tm_eff, tn_eff) * 5 // 4 + (1 << 20),
                             16 << 20), cap))

    out_p = pl.pallas_call(
        _factorized_linear_kernel,
        out_shape=jax.ShapeDtypeStruct((B8, n_pad), out_dtype),
        grid_spec=pltpu.PrefetchScalarGridSpec(
            num_scalar_prefetch=0,
            grid=grid,
            in_specs=[
                # x tile streams over batch (full, unpadded in_features axis)
                pl.BlockSpec((tm_eff, in_features), lambda i, j: (i, 0)),
                # W_in VMEM-resident, single buffer (constant index_map)
                pl.BlockSpec((in_features, rank_pad), lambda i, j: (0, 0),
                             pipeline_mode=pl.Buffered(1)),
                # W_out tile streams over out_features
                pl.BlockSpec((rank_pad, tn_eff), lambda i, j: (0, j)),
                # bias tile streams over out_features
                pl.BlockSpec((1, tn_eff), lambda i, j: (0, j)),
            ],
            out_specs=pl.BlockSpec((tm_eff, tn_eff), lambda i, j: (i, j)),
            scratch_shapes=[pltpu.VMEM((tm_eff, rank_pad), h_dtype)],
        ),
        compiler_params=pltpu.CompilerParams(
            # j must stay innermost + "arbitrary": h is only written at j == 0.
            dimension_semantics=("parallel", "arbitrary"),
            vmem_limit_bytes=vmem_limit),
        cost_estimate=pl.CostEstimate(
            flops=flops, transcendentals=0, bytes_accessed=bytes_accessed),
    )(x2d, w_in_p, w_out_p, bias_p)

    out = out_p[:B, :out_features]
    return out.reshape(*orig_shape[:-1], out_features)


def init_params(key, in_features, out_features, rank):
    """Deterministic init matching PyTorch's reset_parameters() distributions."""
    k1, k2, k3 = jax.random.split(key, 3)
    # kaiming_uniform_(a=sqrt(5)) => bound = 1/sqrt(fan_in)
    bound_in = 1.0 / np.sqrt(in_features)
    input_weight = jax.random.uniform(
        k1, (rank, in_features), jnp.float32, -bound_in, bound_in)
    bound_out = 1.0 / np.sqrt(rank)
    output_weight = jax.random.uniform(
        k2, (out_features, rank), jnp.float32, -bound_out, bound_out)
    bias_bound = 1.0 / np.sqrt(in_features)
    bias = jax.random.uniform(
        k3, (out_features,), jnp.float32, -bias_bound, bias_bound)
    return input_weight, output_weight, bias


if __name__ == "__main__":
    # small shapes consistent with the module
    B, in_features, out_features, rank = 8, 32, 64, 32

    key = jax.random.PRNGKey(0)
    kx, kp = jax.random.split(key)
    x = jax.random.normal(kx, (B, in_features), jnp.float32)
    input_weight, output_weight, bias = init_params(
        kp, in_features, out_features, rank)

    # one-time weight prep (hoisted out of the per-call path)
    params = prepare_factorized_linear_params(input_weight, output_weight, bias)

    out = factorized_linear(x, params)
    out = jax.block_until_ready(out)

    # reference check in plain JAX (F.linear semantics: x @ W^T + b)
    ref = (x @ input_weight.T) @ output_weight.T + bias
    np.testing.assert_allclose(np.asarray(out), np.asarray(ref),
                               rtol=1e-5, atol=1e-5)

    # 3-D input with a flattened batch that is not a multiple of 8
    # (exercises the leading-dim reshape and the minimal batch-pad path)
    x3 = jax.random.normal(jax.random.PRNGKey(1), (2, 5, in_features),
                           jnp.float32)
    out3 = jax.block_until_ready(factorized_linear(x3, params))
    ref3 = (x3 @ input_weight.T) @ output_weight.T + bias
    np.testing.assert_allclose(np.asarray(out3), np.asarray(ref3),
                               rtol=1e-5, atol=1e-5)

    print("KERNEL_OK")
</pallas_src>

<mosaic_0001>
module attributes {stable_mosaic.version = 11 : i64} {
  func.func @_factorized_linear_kernel(%arg0: i32, %arg1: i32, %arg2: memref<8x32xf32, #tpu.memory_space<vmem>>, %arg3: memref<32x128xf32, #tpu.memory_space<vmem>>, %arg4: memref<128x128xf32, #tpu.memory_space<vmem>>, %arg5: memref<1x128xf32, #tpu.memory_space<vmem>>, %arg6: memref<8x128xf32, #tpu.memory_space<vmem>>, %arg7: memref<8x128xf32, #tpu.memory_space<vmem>>) attributes {dimension_semantics = [#tpu.dimension_semantics<parallel>, #tpu.dimension_semantics<arbitrary>], iteration_bounds = array<i64: 1, 1>, scalar_prefetch = 0 : i64, scratch_operands = 1 : i64, tpu.core_type = #tpu.core_type<tc>, window_params = [{transform_indices = @transform_0, window_bounds = array<i64: 8, 32>}, {pipeline_mode = #tpu.pipeline_mode<synchronous>, transform_indices = @transform_1, window_bounds = array<i64: 32, 128>}, {transform_indices = @transform_2, window_bounds = array<i64: 128, 128>}, {transform_indices = @transform_3, window_bounds = array<i64: 1, 128>}, {transform_indices = @transform_4, window_bounds = array<i64: 8, 128>}]} {
    %c0_i32 = arith.constant 0 : i32
    %0 = arith.cmpi eq, %arg1, %c0_i32 : i32
    %1 = arith.extui %0 : i1 to i32
    %c0_i32_0 = arith.constant 0 : i32
    %2 = arith.cmpi ne, %1, %c0_i32_0 : i32
    scf.if %2 {
      %c0_8 = arith.constant 0 : index
      %c0_9 = arith.constant 0 : index
      %10 = vector.load %arg2[%c0_8, %c0_9] : memref<8x32xf32, #tpu.memory_space<vmem>>, vector<8x32xf32>
      %c0_10 = arith.constant 0 : index
      %c0_11 = arith.constant 0 : index
      %11 = vector.load %arg3[%c0_10, %c0_11] : memref<32x128xf32, #tpu.memory_space<vmem>>, vector<32x128xf32>
      %cst_12 = arith.constant dense<0.000000e+00> : vector<8x128xf32>
      %12 = tpu.matmul %10, %11, %cst_12 {dimension_numbers = #tpu.dot_dimension_numbers<[1], [0], [0], [1], [0, 0, 1, 1], [], []>} : vector<8x32xf32>, vector<32x128xf32>, vector<8x128xf32> -> vector<8x128xf32>
      %c0_13 = arith.constant 0 : index
      %c0_14 = arith.constant 0 : index
      %13 = vector.load %arg7[%c0_13, %c0_14] : memref<8x128xf32, #tpu.memory_space<vmem>>, vector<8x128xf32>
      tpu.vector_store %arg7[%c0_13, %c0_14], %12 {strides = array<i32>} : memref<8x128xf32, #tpu.memory_space<vmem>>, vector<8x128xf32>,
    } else {
    }
    %c0 = arith.constant 0 : index
    %c0_1 = arith.constant 0 : index
    %3 = vector.load %arg7[%c0, %c0_1] : memref<8x128xf32, #tpu.memory_space<vmem>>, vector<8x128xf32>
    %c0_2 = arith.constant 0 : index
    %c0_3 = arith.constant 0 : index
    %4 = vector.load %arg4[%c0_2, %c0_3] : memref<128x128xf32, #tpu.memory_space<vmem>>, vector<128x128xf32>
    %cst = arith.constant dense<0.000000e+00> : vector<8x128xf32>
    %5 = tpu.matmul %3, %4, %cst {dimension_numbers = #tpu.dot_dimension_numbers<[1], [0], [0], [1], [0, 0, 1, 1], [], []>} : vector<8x128xf32>, vector<128x128xf32>, vector<8x128xf32> -> vector<8x128xf32>
    %c0_4 = arith.constant 0 : index
    %c0_5 = arith.constant 0 : index
    %6 = vector.load %arg5[%c0_4, %c0_5] : memref<1x128xf32, #tpu.memory_space<vmem>>, vector<1x128xf32>
    %7 = vector.broadcast %6 : vector<1x128xf32> to vector<8x128xf32>
    %8 = arith.addf %5, %7 : vector<8x128xf32>
    %c0_6 = arith.constant 0 : index
    %c0_7 = arith.constant 0 : index
    %9 = vector.load %arg6[%c0_6, %c0_7] : memref<8x128xf32, #tpu.memory_space<vmem>>, vector<8x128xf32>
    tpu.vector_store %arg6[%c0_6, %c0_7], %8 {strides = array<i32>} : memref<8x128xf32, #tpu.memory_space<vmem>>, vector<8x128xf32>,
    return
  }
  func.func @transform_0(%arg0: i32, %arg1: i32) -> (i32, i32) {
    %c0_i32 = arith.constant 0 : i32
    %c0_i32_0 = arith.constant 0 : i32
    return %arg0, %c0_i32 : i32, i32
  }
  func.func @transform_1(%arg0: i32, %arg1: i32) -> (i32, i32) {
    %c0_i32 = arith.constant 0 : i32
    %c0_i32_0 = arith.constant 0 : i32
    %c0_i32_1 = arith.constant 0 : i32
    return %c0_i32, %c0_i32_0 : i32, i32
  }
  func.func @transform_2(%arg0: i32, %arg1: i32) -> (i32, i32) {
    %c0_i32 = arith.constant 0 : i32
    %c0_i32_0 = arith.constant 0 : i32
    return %c0_i32, %arg1 : i32, i32
  }
  func.func @transform_3(%arg0: i32, %arg1: i32) -> (i32, i32) {
    %c0_i32 = arith.constant 0 : i32
    %c0_i32_0 = arith.constant 0 : i32
    return %c0_i32, %arg1 : i32, i32
  }
  func.func @transform_4(%arg0: i32, %arg1: i32) -> (i32, i32) {
    %c0_i32 = arith.constant 0 : i32
    return %arg0, %arg1 : i32, i32
  }
}

</mosaic_0001>

<bundles_post_ra>
// kernel: tpu_custom_call.1
= control target key start
LH: loop header
LB: loop body
LE: loop exit
PB: predicated region body
PF: predicated region fallthrough
CT: control target
= control target key end

     0   :  { %9 = vsyncpa [#allocation4], 0  ;;  %s486_s0 = inlined_call_operand.hbm [shape: f32[8,32], index: 0, kind: input, shape index: {}]   ;;  %s487_s1 = inlined_call_operand.hbm [shape: f32[32,128], index: 1, kind: input, shape index: {}]   ;;  %s488_s2 = inlined_call_operand.hbm [shape: f32[128,128], index: 2, kind: input, shape index: {}]   ;;  %s489_s3 = inlined_call_operand.vmem [shape: f32[1,128], index: 3, kind: input, shape index: {}]   ;;  %s490_s4 = inlined_call_operand.hbm [shape: f32[8,128], index: 4, kind: output, shape index: {}]  }
   0x1   :  { %10 = vsyncpa [#allocation7], 0 }
   0x2   :  { %11 = vsyncpa [#allocation5], 0  ;;  %s416_s15 = smov [#allocation6]  }
   0x3   :  { %s27_s16 = sshll.u32 %s416_s15, 4  ;;  %s28_s16 = int_to_ptr.vmem [resolvable:$true] %s27_s16 }
   0x4   :  { %s338_s17 = scalar_lea.vmem %s28_s16, 512  ;;  %p343_p1 = scmp.lt.s32.totalorder %s28_s16, %s28_s16 }
   0x5   :  { %p339_p0 = scmp.ne.s32.totalorder %s28_s16, %s338_s17  ;;  %p344_p2 = scmp.lt.s32.totalorder %s338_s17, %s338_s17 }
   0x7   :  { %p345_p3 = por %p344_p2, %p343_p1 }
   0x9   :  { %p346_p4 = pnand %p345_p3, %p339_p0 }
   0xb   :  { %349 = shalt.err (!%p346_p4)
}
   0xc   :  { %s417_s18 = smov 128   ;;  %s418_s19 = smov 8  }
   0xd   :  { %33 = dma.hbm_to_vmem [thread:$0]  %s487_s1, 512, %s28_s16, [#allocation7], %s417_s18, %s417_s18, %s418_s19  }
   0xe   :  { %s419_s22 = smov [#allocation3]   ;;  %s420_s24 = smov [#allocation8]  }
   0xf   :  { %s18_s23 = sshll.u32 %s419_s22, 4  ;;  %s39_s25 = sshll.u32 %s420_s24, 4  ;;  %s19_s23 = int_to_ptr.vmem [resolvable:$true] %s18_s23  ;;  %s40_s25 = int_to_ptr.vmem [resolvable:$true] %s39_s25 }
  0x10   :  { %s358_s26 = scalar_lea.vmem %s19_s23, 128  ;;  %p363_p6 = scmp.lt.s32.totalorder %s19_s23, %s19_s23 }
  0x11   :  { %p359_p5 = scmp.ne.s32.totalorder %s19_s23, %s358_s26  ;;  %p364_p7 = scmp.lt.s32.totalorder %s358_s26, %s358_s26 }
  0x13   :  { %p365_p8 = por %p364_p7, %p363_p6 }
  0x15   :  { %p366_p9 = pnand %p365_p8, %p359_p5 }
  0x17   :  { %369 = shalt.err (!%p366_p9)
}
  0x18   :  { %21 = dma.hbm_to_vmem [thread:$0]  %s486_s0, 128, %s19_s23, [#allocation4]  }
  0x19   :  { %s378_s29 = scalar_lea.vmem %s40_s25, 2048  ;;  %p383_p11 = scmp.lt.s32.totalorder %s40_s25, %s40_s25 }
  0x1a   :  { %p379_p10 = scmp.ne.s32.totalorder %s40_s25, %s378_s29  ;;  %p384_p12 = scmp.lt.s32.totalorder %s378_s29, %s378_s29 }
  0x1c   :  { %p385_p13 = por %p384_p12, %p383_p11 }
  0x1e   :  { %p386_p0 = pnand %p385_p13, %p379_p10 }
  0x20   :  { %389 = shalt.err (!%p386_p0)
}
  0x21   :  { %45 = dma.hbm_to_vmem [thread:$0]  %s488_s2, 2048, %s40_s25, [#allocation7], %s417_s18, %s417_s18, %s418_s19  }
  0x22   :  { %410 = dma.done.wait [#allocation4], 128  }
  0x23   :  { %411 = vsyncadd [#allocation4], 4294967168 }
  0x24   :  { %412 = dma.done.wait [#allocation7], 2560  }
  0x25   :  { %413 = vsyncadd [#allocation7], 4294964736  ;;  %v421_v0 = vmov 0.0   ;;  %vm422_vm0 = vmmov 0   ;;  %v65_v1 = vld [vmem:[#allocation6 + $0x18] sm:$0xff]  ;;  %v64_v2 = vld [vmem:[#allocation6 + $0x10] sm:$0xff] }
  0x26   :  { %276 = vmatprep.subr.mxu0 %v421_v0  ;;  %284 = vmatprep.mubr.msk.f32.mxu0 %vm422_vm0, %v421_v0  ;;  %v157_v3 = vld [vmem:[#allocation8 + $0x78] sm:$0xff]  ;;  %v63_v4 = vld [vmem:[#allocation6 + $0x8] sm:$0xff]  ;;  %v156_v5 = vld [vmem:[#allocation8 + $0x70] sm:$0xff]  ;;  %vm66_vm1 = vcmask 261120   ;;  %s423_s5 = smov [#allocation9]  }
  0x27   :  { %287 = vmatprep.subr.mxu1 %v421_v0  ;;  %319 = vmatprep.mubr.msk.f32.mxu1 %vm422_vm0, %v421_v0  ;;  %v155_v6 = vld [vmem:[#allocation8 + $0x68] sm:$0xff]  ;;  %v62_v7 = vld [vmem:[#allocation6] sm:$0xff]  ;;  %v61_v8 = vld [vmem:[#allocation3] sm:$0xff]  ;;  %s242_s6 = sshll.u32 %s423_s5, 4  ;;  %s243_s6 = int_to_ptr.vmem [resolvable:$true] %s242_s6 }
  0x28   :  { %277 = vmatpush3.msra.mxu0 %v65_v1  ;;  %288 = vmatpush3.msra.mxu1 %v157_v3  ;;  %v154_v9 = vld [vmem:[#allocation8 + $0x60] sm:$0xff]  ;;  %v153_v10 = vld [vmem:[#allocation8 + $0x58] sm:$0xff]  ;;  %v152_v11 = vld [vmem:[#allocation8 + $0x50] sm:$0xff]  ;;  %s390_s7 = scalar_lea.vmem %s243_s6, 128  ;;  %p395_p2 = scmp.lt.s32.totalorder %s243_s6, %s243_s6 }
  0x29   :  { %278 = vmatprep.subr.mxu0 %v421_v0  ;;  %289 = vmatprep.subr.mxu1 %v421_v0  ;;  %v151_v12 = vld [vmem:[#allocation8 + $0x48] sm:$0xff]  ;;  %v150_v13 = vld [vmem:[#allocation8 + $0x40] sm:$0xff]  ;;  %v149_v14 = vld [vmem:[#allocation8 + $0x38] sm:$0xff]  ;;  %p391_p1 = scmp.ne.s32.totalorder %s243_s6, %s390_s7  ;;  %p396_p3 = scmp.lt.s32.totalorder %s390_s7, %s390_s7 }
  0x2a   :  { %279 = vmatpush3.msra.mxu0 %v64_v2  ;;  %290 = vmatpush3.msra.mxu1 %v156_v5  ;;  %v148_v15 = vld [vmem:[#allocation8 + $0x30] sm:$0xff]  ;;  %v147_v16 = vld [vmem:[#allocation8 + $0x28] sm:$0xff]  ;;  %v146_v17 = vld [vmem:[#allocation8 + $0x20] sm:$0xff] }
  0x2b   :  { %280 = vmatprep.subr.mxu0 %v421_v0  ;;  %291 = vmatprep.subr.mxu1 %v421_v0  ;;  %v145_v18 = vld [vmem:[#allocation8 + $0x18] sm:$0xff]  ;;  %v144_v19 = vld [vmem:[#allocation8 + $0x10] sm:$0xff]  ;;  %v143_v20 = vld [vmem:[#allocation8 + $0x8] sm:$0xff]  ;;  %p397_p4 = por %p396_p3, %p395_p2 }
  0x2c   :  { %281 = vmatpush3.msra.mxu0 %v63_v4  ;;  %292 = vmatpush3.msra.mxu1 %v155_v6  ;;  %v142_v21 = vld [vmem:[#allocation8] sm:$0xff]  ;;  %v253_v24 = vld [vmem:[%s489_s3] ss:$0 sm:$0xff] }
  0x2d   :  { %282 = vmatprep.subr.mxu0 %v421_v0  ;;  %293 = vmatprep.subr.mxu1 %v421_v0  ;;  %p398_p5 = pnand %p397_p4, %p391_p1 }
  0x2e   :  { %283 = vmatpush3.msra.mxu0 %v62_v7  ;;  %294 = vmatpush3.msra.mxu1 %v154_v9 }
  0x2f   :  { %285 = vmatmul.mubr.msk.f32.vlgmr.msra.gmra.mxu0 %vm66_vm1, %v61_v8  ;;  %295 = vmatprep.subr.mxu1 %v421_v0 }
  0x30   :  { %296 = vmatpush3.msra.mxu1 %v153_v10 }
  0x31   :  { %297 = vmatprep.subr.mxu1 %v421_v0 }
  0x32   :  { %298 = vmatpush3.msra.mxu1 %v152_v11 }
  0x33   :  { %299 = vmatprep.subr.mxu1 %v421_v0 }
  0x34   :  { %300 = vmatpush3.msra.mxu1 %v151_v12 }
  0x35   :  { %301 = vmatprep.subr.mxu1 %v421_v0 }
  0x36   :  { %302 = vmatpush3.msra.mxu1 %v150_v13 }
  0x37   :  { %303 = vmatprep.subr.mxu1 %v421_v0 }
  0x38   :  { %304 = vmatpush3.msra.mxu1 %v149_v14 }
  0x39   :  { %305 = vmatprep.subr.mxu1 %v421_v0 }
  0x3a   :  { %306 = vmatpush3.msra.mxu1 %v148_v15 }
  0x3b   :  { %307 = vmatprep.subr.mxu1 %v421_v0 }
  0x3c   :  { %308 = vmatpush3.msra.mxu1 %v147_v16 }
  0x3d   :  { %309 = vmatprep.subr.mxu1 %v421_v0 }
  0x3e   :  { %310 = vmatpush3.msra.mxu1 %v146_v17 }
  0x3f   :  { %311 = vmatprep.subr.mxu1 %v421_v0 }
  0x40   :  { %312 = vmatpush3.msra.mxu1 %v145_v18 }
  0x41   :  { %313 = vmatprep.subr.mxu1 %v421_v0 }
  0x42   :  { %314 = vmatpush3.msra.mxu1 %v144_v19 }
  0x43   :  { %315 = vmatprep.subr.mxu1 %v421_v0 }
  0x44   :  { %316 = vmatpush3.msra.mxu1 %v143_v20 }
  0x45   :  { %317 = vmatprep.subr.mxu1 %v421_v0 }
  0x46   :  { %318 = vmatpush3.msra.mxu1 %v142_v21 }
  0xef   :  { %v136_v22 = vpop.f32.mrf.mxu0 }
  0xf0   :  { %320 = vmatmul.mubr.f32.vlgmr.msra.gmra.mxu1 %v136_v22 }
  0xf1   :  { %v286_v23 = vpop.f32.mrf.mxu0 }
 0x1b0   :  { %v231_v25 = vpop.f32.mrf.mxu1 }
 0x1b1   :  { %v232_v26 = vadd.f32 %v253_v24, %v231_v25 }
 0x1b2   :  { %v321_v27 = vpop.f32.mrf.mxu1 }
 0x1b3   :  { %235 = vst [vmem:[#allocation9] sm:$0xff] %v232_v26 }
 0x1b4   :  { %401 = shalt.err (!%p398_p5)
}
 0x1b5   :  { %245 = dma.vmem_to_hbm [thread:$0]  %s243_s6, 128, %s490_s4, [#allocation5]  }
 0x1b6   :  { %414 = dma.done.wait [#allocation5], 128  }
 0x1b7   :  { %415 = vsyncadd [#allocation5], 4294967168 }
 0x1b8   :  { %249 = vsyncpa [#allocation4], 1 }
 0x1b9   :  { %250 = vsyncpa [#allocation7], 1 }
 0x1ba   :  { %251 = vsyncpa [#allocation5], 1 }

</bundles_post_ra>
